<compile_context>
chip_gen: v7x
topology: tpu7x:2x2x1
jax: 0.10.0
libtpu: 0.0.40
codegen_flags: <defaults>
</compile_context>

<pallas_src>
import jax
import jax.numpy as jnp
from jax.experimental import pallas as pl
from jax.experimental.pallas import tpu as pltpu


def mlp_kernel(x_ref,
               w1_ref, b1_ref,
               w2_ref, b2_ref,
               w3_ref, b3_ref,
               w4_ref, b4_ref,
               o_ref):
    # x_ref: (1, T) — batch tile on the lane axis.
    x = x_ref[...].astype(jnp.float32)                        # (1, T)

    # Layer 1 (1 -> 20): K=1 contraction == outer product, keep it on the VPU.
    h = jnp.maximum(w1_ref[...] * x + b1_ref[...], 0.0)       # (20, T) f32

    # Layer 2 (20 -> 50): bf16-input MXU matmul, f32 accumulation, f32 bias+ReLU.
    h = jnp.dot(w2_ref[...], h.astype(jnp.bfloat16),
                preferred_element_type=jnp.float32) + b2_ref[...]
    h = jnp.maximum(h, 0.0)                                    # (50, T) f32

    # Layer 3 (50 -> 20): bf16-input MXU matmul.
    h = jnp.dot(w3_ref[...], h.astype(jnp.bfloat16),
                preferred_element_type=jnp.float32) + b3_ref[...]
    h = jnp.maximum(h, 0.0)                                    # (20, T) f32

    # Layer 4 (20 -> 1): VPU multiply + sublane reduction instead of a K=20,
    # single-output-row MXU pass.
    out = jnp.sum(w4_ref[...] * h, axis=0, keepdims=True) + b4_ref[...]   # (1, T)
    o_ref[...] = out.astype(o_ref.dtype)


def net_relu4_slim(x, params, *, batch_tile=2048):
    """x: (B, 1) float32. params: W1..W4 stored (in, out) and b1..b4 (1, out)."""
    B, F = x.shape
    assert F == 1
    assert batch_tile % 128 == 0, "batch_tile must be a multiple of 128 (lane width)"

    # (B, 1) -> (1, B) is a pure reshape for a contiguous array (no transpose pass).
    x_row = jnp.reshape(x, (1, B))

    n_tiles = pl.cdiv(B, batch_tile)
    b_pad = n_tiles * batch_tile
    if b_pad != B:
        # Single pad op only for ragged batches; padded lanes compute
        # garbage-but-finite values and are sliced off below.
        x_row = jnp.pad(x_row, ((0, 0), (0, b_pad - B)))

    # Transposed (out_features, in_features) weights / column biases — done in
    # the wrapper so the kernel sees the layout it wants.  W2/W3 pre-cast to
    # bf16 once (MXU-native on v6e/v7x; f32 accumulation preserved in-kernel).
    w1t = params["W1"].T                       # (20, 1)  f32
    b1c = params["b1"].T                       # (20, 1)  f32
    w2t = params["W2"].T.astype(jnp.bfloat16)  # (50, 20) bf16
    b2c = params["b2"].T                       # (50, 1)  f32
    w3t = params["W3"].T.astype(jnp.bfloat16)  # (20, 50) bf16
    b3c = params["b3"].T                       # (20, 1)  f32
    w4c = params["W4"]                         # (20, 1)  f32 (already a column)
    b4c = params["b4"]                         # (1, 1)   f32

    # Whole-array, grid-invariant VMEM residency for the (tiny) model params.
    vmem_whole = pl.BlockSpec(memory_space=pltpu.MemorySpace.VMEM)

    out_row = pl.pallas_call(
        mlp_kernel,
        out_shape=jax.ShapeDtypeStruct((1, b_pad), x.dtype),
        grid_spec=pl.GridSpec(
            grid=(n_tiles,),
            in_specs=[
                pl.BlockSpec((1, batch_tile), lambda i: (0, i)),  # X tile (lane-dense)
                vmem_whole, vmem_whole,   # W1, b1
                vmem_whole, vmem_whole,   # W2, b2
                vmem_whole, vmem_whole,   # W3, b3
                vmem_whole, vmem_whole,   # W4, b4
            ],
            out_specs=pl.BlockSpec((1, batch_tile), lambda i: (0, i)),
        ),
        compiler_params=pltpu.CompilerParams(
            dimension_semantics=("parallel",)),
    )(x_row, w1t, b1c, w2t, b2c, w3t, b3c, w4c, b4c)

    if b_pad != B:
        out_row = out_row[:, :B]
    return jnp.reshape(out_row, (B, 1))


def init_params(key):
    """Deterministic init mimicking PyTorch nn.Linear default (U[-1/sqrt(fan_in), 1/sqrt(fan_in)])."""
    dims = [(1, 20), (20, 50), (50, 20), (20, 1)]
    params = {}
    for idx, (fan_in, fan_out) in enumerate(dims, start=1):
        key, kw, kb = jax.random.split(key, 3)
        bound = 1.0 / jnp.sqrt(jnp.float32(fan_in))
        params[f"W{idx}"] = jax.random.uniform(
            kw, (fan_in, fan_out), jnp.float32, -bound, bound)
        params[f"b{idx}"] = jax.random.uniform(
            kb, (1, fan_out), jnp.float32, -bound, bound)
    return params


def reference_forward(x, params):
    h = x
    h = jnp.maximum(h @ params["W1"] + params["b1"], 0.0)
    h = jnp.maximum(h @ params["W2"] + params["b2"], 0.0)
    h = jnp.maximum(h @ params["W3"] + params["b3"], 0.0)
    return h @ params["W4"] + params["b4"]


if __name__ == "__main__":
    key = jax.random.PRNGKey(0)
    k_x, k_p = jax.random.split(key)

    # Small demo batch, but lane-dense tiles and 4 parallel grid steps so both
    # v7x TensorCores get >= 2 tiles each (no-op on v5e/v6e).
    B = 1024
    x = jax.random.normal(k_x, (B, 1), jnp.float32)
    params = init_params(k_p)

    out = net_relu4_slim(x, params, batch_tile=256)
    out = jax.block_until_ready(out)

    ref = reference_forward(x, params)
    assert out.shape == (B, 1)
    # Tolerance relaxed for bf16 MXU inputs (f32 accumulation, f32 bias/ReLU).
    assert jnp.allclose(out, ref, atol=2e-2, rtol=2e-2), "mismatch vs reference"

    print("KERNEL_OK")
</pallas_src>

<mosaic_0001>
module attributes {stable_mosaic.version = 11 : i64} {
  func.func @mlp_kernel(%arg0: i32, %arg1: memref<1x256xf32, #tpu.memory_space<vmem>>, %arg2: memref<20x1xf32, #tpu.memory_space<vmem>>, %arg3: memref<20x1xf32, #tpu.memory_space<vmem>>, %arg4: memref<50x20xbf16, #tpu.memory_space<vmem>>, %arg5: memref<50x1xf32, #tpu.memory_space<vmem>>, %arg6: memref<20x50xbf16, #tpu.memory_space<vmem>>, %arg7: memref<20x1xf32, #tpu.memory_space<vmem>>, %arg8: memref<20x1xf32, #tpu.memory_space<vmem>>, %arg9: memref<1x1xf32, #tpu.memory_space<vmem>>, %arg10: memref<1x256xf32, #tpu.memory_space<vmem>>) attributes {dimension_semantics = [#tpu.dimension_semantics<parallel>], iteration_bounds = array<i64: 4>, scalar_prefetch = 0 : i64, scratch_operands = 0 : i64, tpu.core_type = #tpu.core_type<tc>, window_params = [{transform_indices = @transform_0, window_bounds = array<i64: 1, 256>}, {pipeline_mode = #tpu.pipeline_mode<synchronous>, transform_indices = @transform_1, window_bounds = array<i64: 20, 1>}, {pipeline_mode = #tpu.pipeline_mode<synchronous>, transform_indices = @transform_2, window_bounds = array<i64: 20, 1>}, {pipeline_mode = #tpu.pipeline_mode<synchronous>, transform_indices = @transform_3, window_bounds = array<i64: 50, 20>}, {pipeline_mode = #tpu.pipeline_mode<synchronous>, transform_indices = @transform_4, window_bounds = array<i64: 50, 1>}, {pipeline_mode = #tpu.pipeline_mode<synchronous>, transform_indices = @transform_5, window_bounds = array<i64: 20, 50>}, {pipeline_mode = #tpu.pipeline_mode<synchronous>, transform_indices = @transform_6, window_bounds = array<i64: 20, 1>}, {pipeline_mode = #tpu.pipeline_mode<synchronous>, transform_indices = @transform_7, window_bounds = array<i64: 20, 1>}, {pipeline_mode = #tpu.pipeline_mode<synchronous>, transform_indices = @transform_8, window_bounds = array<i64: 1, 1>}, {transform_indices = @transform_9, window_bounds = array<i64: 1, 256>}]} {
    %c0 = arith.constant 0 : index
    %c0_0 = arith.constant 0 : index
    %0 = vector.load %arg1[%c0, %c0_0] : memref<1x256xf32, #tpu.memory_space<vmem>>, vector<1x256xf32>
    %c0_1 = arith.constant 0 : index
    %c0_2 = arith.constant 0 : index
    %1 = vector.load %arg2[%c0_1, %c0_2] : memref<20x1xf32, #tpu.memory_space<vmem>>, vector<20x1xf32>
    %2 = vector.broadcast %1 : vector<20x1xf32> to vector<20x256xf32>
    %3 = vector.broadcast %0 : vector<1x256xf32> to vector<20x256xf32>
    %4 = arith.mulf %2, %3 : vector<20x256xf32>
    %c0_3 = arith.constant 0 : index
    %c0_4 = arith.constant 0 : index
    %5 = vector.load %arg3[%c0_3, %c0_4] : memref<20x1xf32, #tpu.memory_space<vmem>>, vector<20x1xf32>
    %6 = vector.broadcast %5 : vector<20x1xf32> to vector<20x256xf32>
    %7 = arith.addf %4, %6 : vector<20x256xf32>
    %cst = arith.constant 0.000000e+00 : f32
    %8 = vector.broadcast %cst : f32 to vector<20x256xf32>
    %9 = arith.maximumf %7, %8 : vector<20x256xf32>
    %c0_5 = arith.constant 0 : index
    %c0_6 = arith.constant 0 : index
    %10 = vector.load %arg4[%c0_5, %c0_6] : memref<50x20xbf16, #tpu.memory_space<vmem>>, vector<50x20xbf16>
    %11 = arith.truncf %9 : vector<20x256xf32> to vector<20x256xbf16>
    %cst_7 = arith.constant dense<0.000000e+00> : vector<50x256xf32>
    %12 = tpu.matmul %10, %11, %cst_7 {dimension_numbers = #tpu.dot_dimension_numbers<[1], [0], [0], [1], [0, 0, 1, 1], [], []>} : vector<50x20xbf16>, vector<20x256xbf16>, vector<50x256xf32> -> vector<50x256xf32>
    %c0_8 = arith.constant 0 : index
    %c0_9 = arith.constant 0 : index
    %13 = vector.load %arg5[%c0_8, %c0_9] : memref<50x1xf32, #tpu.memory_space<vmem>>, vector<50x1xf32>
    %14 = vector.broadcast %13 : vector<50x1xf32> to vector<50x256xf32>
    %15 = arith.addf %12, %14 : vector<50x256xf32>
    %cst_10 = arith.constant 0.000000e+00 : f32
    %16 = vector.broadcast %cst_10 : f32 to vector<50x256xf32>
    %17 = arith.maximumf %15, %16 : vector<50x256xf32>
    %c0_11 = arith.constant 0 : index
    %c0_12 = arith.constant 0 : index
    %18 = vector.load %arg6[%c0_11, %c0_12] : memref<20x50xbf16, #tpu.memory_space<vmem>>, vector<20x50xbf16>
    %19 = arith.truncf %17 : vector<50x256xf32> to vector<50x256xbf16>
    %cst_13 = arith.constant dense<0.000000e+00> : vector<20x256xf32>
    %20 = tpu.matmul %18, %19, %cst_13 {dimension_numbers = #tpu.dot_dimension_numbers<[1], [0], [0], [1], [0, 0, 1, 1], [], []>} : vector<20x50xbf16>, vector<50x256xbf16>, vector<20x256xf32> -> vector<20x256xf32>
    %c0_14 = arith.constant 0 : index
    %c0_15 = arith.constant 0 : index
    %21 = vector.load %arg7[%c0_14, %c0_15] : memref<20x1xf32, #tpu.memory_space<vmem>>, vector<20x1xf32>
    %22 = vector.broadcast %21 : vector<20x1xf32> to vector<20x256xf32>
    %23 = arith.addf %20, %22 : vector<20x256xf32>
    %cst_16 = arith.constant 0.000000e+00 : f32
    %24 = vector.broadcast %cst_16 : f32 to vector<20x256xf32>
    %25 = arith.maximumf %23, %24 : vector<20x256xf32>
    %c0_17 = arith.constant 0 : index
    %c0_18 = arith.constant 0 : index
    %26 = vector.load %arg8[%c0_17, %c0_18] : memref<20x1xf32, #tpu.memory_space<vmem>>, vector<20x1xf32>
    %27 = vector.broadcast %26 : vector<20x1xf32> to vector<20x256xf32>
    %28 = arith.mulf %27, %25 : vector<20x256xf32>
    %cst_19 = arith.constant dense<0.000000e+00> : vector<256xf32>
    %29 = vector.multi_reduction <add>, %28, %cst_19 [0] : vector<20x256xf32> to vector<256xf32>
    %30 = vector.shape_cast %29 : vector<256xf32> to vector<1x256xf32>
    %c0_20 = arith.constant 0 : index
    %c0_21 = arith.constant 0 : index
    %31 = vector.load %arg9[%c0_20, %c0_21] : memref<1x1xf32, #tpu.memory_space<vmem>>, vector<1x1xf32>
    %32 = vector.broadcast %31 : vector<1x1xf32> to vector<1x256xf32>
    %33 = arith.addf %30, %32 : vector<1x256xf32>
    %c0_22 = arith.constant 0 : index
    %c0_23 = arith.constant 0 : index
    %34 = vector.load %arg10[%c0_22, %c0_23] : memref<1x256xf32, #tpu.memory_space<vmem>>, vector<1x256xf32>
    tpu.vector_store %arg10[%c0_22, %c0_23], %33 {strides = array<i32>} : memref<1x256xf32, #tpu.memory_space<vmem>>, vector<1x256xf32>,
    return
  }
  func.func @transform_0(%arg0: i32) -> (i32, i32) {
    %c0_i32 = arith.constant 0 : i32
    %c0_i32_0 = arith.constant 0 : i32
    return %c0_i32, %arg0 : i32, i32
  }
  func.func @transform_1(%arg0: i32) -> (i32, i32) {
    %c0_i32 = arith.constant 0 : i32
    %c0_i32_0 = arith.constant 0 : i32
    %c0_i32_1 = arith.constant 0 : i32
    return %c0_i32, %c0_i32_0 : i32, i32
  }
  func.func @transform_2(%arg0: i32) -> (i32, i32) {
    %c0_i32 = arith.constant 0 : i32
    %c0_i32_0 = arith.constant 0 : i32
    %c0_i32_1 = arith.constant 0 : i32
    return %c0_i32, %c0_i32_0 : i32, i32
  }
  func.func @transform_3(%arg0: i32) -> (i32, i32) {
    %c0_i32 = arith.constant 0 : i32
    %c0_i32_0 = arith.constant 0 : i32
    %c0_i32_1 = arith.constant 0 : i32
    return %c0_i32, %c0_i32_0 : i32, i32
  }
  func.func @transform_4(%arg0: i32) -> (i32, i32) {
    %c0_i32 = arith.constant 0 : i32
    %c0_i32_0 = arith.constant 0 : i32
    %c0_i32_1 = arith.constant 0 : i32
    return %c0_i32, %c0_i32_0 : i32, i32
  }
  func.func @transform_5(%arg0: i32) -> (i32, i32) {
    %c0_i32 = arith.constant 0 : i32
    %c0_i32_0 = arith.constant 0 : i32
    %c0_i32_1 = arith.constant 0 : i32
    return %c0_i32, %c0_i32_0 : i32, i32
  }
  func.func @transform_6(%arg0: i32) -> (i32, i32) {
    %c0_i32 = arith.constant 0 : i32
    %c0_i32_0 = arith.constant 0 : i32
    %c0_i32_1 = arith.constant 0 : i32
    return %c0_i32, %c0_i32_0 : i32, i32
  }
  func.func @transform_7(%arg0: i32) -> (i32, i32) {
    %c0_i32 = arith.constant 0 : i32
    %c0_i32_0 = arith.constant 0 : i32
    %c0_i32_1 = arith.constant 0 : i32
    return %c0_i32, %c0_i32_0 : i32, i32
  }
  func.func @transform_8(%arg0: i32) -> (i32, i32) {
    %c0_i32 = arith.constant 0 : i32
    %c0_i32_0 = arith.constant 0 : i32
    %c0_i32_1 = arith.constant 0 : i32
    return %c0_i32, %c0_i32_0 : i32, i32
  }
  func.func @transform_9(%arg0: i32) -> (i32, i32) {
    %c0_i32 = arith.constant 0 : i32
    %c0_i32_0 = arith.constant 0 : i32
    return %c0_i32, %arg0 : i32, i32
  }
}

</mosaic_0001>

<bundles_post_ra>
// kernel: tpu_custom_call.1
= control target key start
LH: loop header
LB: loop body
LE: loop exit
PB: predicated region body
PF: predicated region fallthrough
CT: control target
= control target key end

     0   :  { %s1221_s0 = inlined_call_operand.vmem [shape: f32[1,1024], index: 0, kind: input, shape index: {}]   ;;  %s1222_s1 = inlined_call_operand.vmem [shape: f32[20,1], index: 1, kind: input, shape index: {}]   ;;  %s1223_s2 = inlined_call_operand.vmem [shape: f32[20,1], index: 2, kind: input, shape index: {}]   ;;  %s1224_s3 = inlined_call_operand.vmem [shape: bf16[50,20], index: 3, kind: input, shape index: {}]   ;;  %s1225_s4 = inlined_call_operand.vmem [shape: f32[50,1], index: 4, kind: input, shape index: {}]   ;;  %s1226_s5 = inlined_call_operand.vmem [shape: bf16[20,50], index: 5, kind: input, shape index: {}]   ;;  %s1227_s6 = inlined_call_operand.vmem [shape: f32[20,1], index: 6, kind: input, shape index: {}]   ;;  %s1228_s7 = inlined_call_operand.vmem [shape: f32[20,1], index: 7, kind: input, shape index: {}]   ;;  %s1229_s8 = inlined_call_operand.<no memory space> [shape: f32[1,1], index: 8, kind: input, shape index: {}]   ;;  %s1230_s9 = inlined_call_operand.hbm [shape: f32[1,1024], index: 9, kind: output, shape index: {}]  }
   0x1   :  { %v14_v0 = vstv %s1229_s8 }
   0x2   :  { %15 = vst [vmem:[#allocation2] sm:$0x1] %v14_v0 }
   0x3   :  { %16 = vsyncpa [#allocation4], 0 }
   0x4   :  { %18 = vsyncpa [#allocation4 + $0x1], 0  ;;  %s1028_s11 = smov 0   ;;  %s1030_s12 = smov 0  }
   0x5   :  { %s1032_s13 = smov 0   ;;  %s1034_s14 = smov 0  }
   0x6 LB: > { %s1049_s8 = sadd.s32 4294967295, %s970_s14   ;;  %s833_s15 = sadd.s32 4294967294, %s970_s14   ;;  %s970_s14 = sphi %s1034_s14, %s1236_s14   ;;  %s966_s13 = sphi %s1032_s13, %s1235_s13   ;;  %s962_s12 = sphi %s1030_s12, %s1234_s12   ;;  %s958_s11 = sphi %s1028_s11, %s1233_s11  }
   0x7   : > { %s1053_s16 = sadd.s32 1, %s970_s14   ;;  %s225_s17 = sadd.s32 1, %s966_s13 }
   0x8   : > { %s222_s18 = ssub.s32 %s970_s14, %s1053_s16  ;;  %p235_p0 = scmp.ne.s32.totalorder %s966_s13, %s962_s12 }
   0x9   : > { %p223_p1 = scmp.eq.s32.totalorder %s222_s18, 0  ;;  %p236_p2 = scmp.eq.s32.totalorder %s1049_s8, 3 }
   0xa   : > { %p241_p3 = scmp.ne.s32.totalorder %s962_s12, %s958_s11  ;;  %p242_p4 = scmp.eq.s32.totalorder %s833_s15, 3 }
   0xb   : > { %s1064_s19 = scalar_select %p223_p1, %s966_s13, %s225_s17  }
   0xc   : > { %p1066_p5 = por %p236_p2, %p235_p0  ;;  %p1070_p6 = por %p242_p4, %p241_p3 }
   0xd   : > { %p836_p7 = scmp.ge.s32.totalorder %s970_s14, 1  ;;  %p292_p8 = scmp.lt.s32.totalorder %s970_s14, 5 }
   0xf   : > { %p293_p9 = pnand %p836_p7, %p292_p8 }
  0x10   : > { %v370_v1 = vld [vmem:[%s1223_s2] sm:$0xff] (!%p293_p9)  ;;  %v972_v3 = vmov (!%p293_p9), 0   ;;  %v371_v4 = vld [vmem:[%s1223_s2 + $0x8] sm:$0xff] (!%p293_p9)  ;;  %v372_v6 = vld [vmem:[%s1223_s2 + $0x10] sm:$0xf] (!%p293_p9)  ;;  %s838_s18 = sshll.u32 (!%p293_p9), %s1049_s8, 1  ;;  %v354_v22 = vlaneseq (!%p293_p9) }
  0x11   : > { %296 = sbr.rel (%p293_p9) target bundleno = 677 (0x2a5), region = 56  ;;  %v335_v2 = vld [vmem:[%s1222_s1] sm:$0xff] (!%p293_p9)  ;;  %901 = vset.pattern.permute.xlu1 (!%p293_p9), %v972_v3  ;;  %900 = vset.pattern.permute.xlu0 (!%p293_p9), %v972_v3  ;;  %v336_v5 = vld [vmem:[%s1222_s1 + $0x8] sm:$0xff] (!%p293_p9)  ;;  %v337_v7 = vld [vmem:[%s1222_s1 + $0x10] sm:$0xf] (!%p293_p9)  ;;  %p328_p10 = scmp.lt.s32.totalorder (!%p293_p9), %s838_s18, 7 }
  0x12   : > { %375 = vperm.xlu1 (!%p293_p9), %901, %v370_v1   ;;  %340 = vperm.xlu0 (!%p293_p9), %900, %v335_v2   ;;  %v412_v8 = vld [vmem:[%s1225_s4 + $0x8] sm:$0xff] (!%p293_p9)  ;;  %v411_v9 = vld [vmem:[%s1225_s4] sm:$0xff] (!%p293_p9)  ;;  %v414_v10 = vld [vmem:[%s1225_s4 + $0x18] sm:$0xff] (!%p293_p9)  ;;  %v1139_v23 = vshrl.u32 (!%p293_p9), %v354_v22, 7  ;;  %vm484_vm0 = vcmask (!%p293_p9), 1041408   ;;  %vm471_vm1 = vcmask (!%p293_p9), 162816  }
  0x13   : > { %523 = vmatprep.mubr.bf16.mxu0 (!%p293_p9), %v972_v3  ;;  %659 = vmatprep.mubr.bf16.mxu1 (!%p293_p9), %v972_v3  ;;  %v413_v11 = vld [vmem:[%s1225_s4 + $0x10] sm:$0xff] (!%p293_p9)  ;;  %v416_v12 = vld [vmem:[%s1225_s4 + $0x28] sm:$0xff] (!%p293_p9)  ;;  %v415_v13 = vld [vmem:[%s1225_s4 + $0x20] sm:$0xff] (!%p293_p9)  ;;  %vm620_vm2 = vcmask (!%p293_p9), 1040384   ;;  %vm613_vm3 = vcmask (!%p293_p9), 408576   ;;  %vm709_vm4 = vcmask (!%p293_p9), 1043456  }
  0x14   : > { %v587_v14 = vld [vmem:[%s1227_s6] sm:$0xff] (!%p293_p9)  ;;  %v417_v15 = vld [vmem:[%s1225_s4 + $0x30] sm:$0x3] (!%p293_p9)  ;;  %v588_v17 = vld [vmem:[%s1227_s6 + $0x8] sm:$0xff] (!%p293_p9)  ;;  %v356_v24 = vsub.s32 (!%p293_p9), 0, %v1139_v23  ;;  %v360_v25 = vsub.s32 (!%p293_p9), 1, %v1139_v23 }
  0x15   : > { %v589_v16 = vld [vmem:[%s1227_s6 + $0x10] sm:$0xf] (!%p293_p9)  ;;  %v685_v18 = vld [vmem:[%s1228_s7 + $0x8] sm:$0xff] (!%p293_p9)  ;;  %v684_v19 = vld [vmem:[%s1228_s7] sm:$0xff] (!%p293_p9)  ;;  %s858_s26 = sshll.u32 (!%p293_p9), %s1049_s8, 5  ;;  %vm759_vm5 = vcmp.lt.s32.totalorder (!%p293_p9), %v354_v22, 256 }
  0x16   : > { %380 = vperm.xlu1 (!%p293_p9), %901, %v371_v4   ;;  %345 = vperm.xlu0 (!%p293_p9), %900, %v336_v5   ;;  %v727_v20 = vld [vmem:[#allocation2] sm:$0x1] (!%p293_p9)  ;;  %v686_v21 = vld [vmem:[%s1228_s7 + $0x10] sm:$0xf] (!%p293_p9)  ;;  %v903_v59 = vld [vmem:[%s1224_s3 + $0x8] sm:$0xff] (!%p293_p9)   ;;  %s1179_s10 = scalar_lea.hbm (!%p293_p9), %s1230_s9, %s858_s26  ;;  %s974_s8 = smov (!%p293_p9), [#allocation3]  }
  0x17   : > { %v902_v58 = vld [vmem:[%s1224_s3] sm:$0xff] (!%p293_p9)   ;;  %v904_v60 = vld [vmem:[%s1224_s3 + $0x10] sm:$0xff] (!%p293_p9)   ;;  %v905_v61 = vld [vmem:[%s1224_s3 + $0x18] ss:$0 sps:$4 sm:$0x11] (!%p293_p9)  }
  0x18   : > { %s1238_s18 = smov (!%p328_p10, %s838_s18), 7 }
  0x19   : > { %s330_s24 = scalar_lea.vmem %s1221_s0, %s1238_s18  ;;  %s912_s18 = sshll.u32 %s974_s8, 4  ;;  %s913_s18 = int_to_ptr.vmem [resolvable:$false] %s912_s18 }
  0x1a   : > { %385 = vperm.xlu1 %901, %v372_v6   ;;  %350 = vperm.xlu0 %900, %v337_v7   ;;  %v334_v26 = vld [vmem:[%s330_s24] sm:$0x3]  ;;  %s324_s24 = sand.u32 1, %s962_s12   ;;  %s914_s22 = scalar_lea.vmem %s913_s18, 64 }
  0x1b   : > { %v357_v27 = vrot.slane %v334_v26, %v356_v24  ;;  %v361_v28 = vrot.slane %v334_v26, %v360_v25  ;;  %s837_s25 = sshll.u32 %s324_s24, 1  ;;  %s763_s15 = scalar_lea.sflag [#allocation4], %s324_s24 }
  0x1c   : > { %s326_s27 = scalar_lea.vmem [#allocation3], %s837_s25 }
  0x1d   : > { %s777_s28 = sshll.u32 %s326_s27, 4  ;;  %s1181_s28 = int_to_ptr.vmem [resolvable:$true] %s777_s28 }
  0x1e   : > { %425 = vperm.xlu1 %901, %v412_v8   ;;  %420 = vperm.xlu0 %900, %v411_v9   ;;  %s908_s17 = scalar_lea.vmem %s1181_s28, 32  ;;  %p915_p0 = scmp.lt.s32.totalorder %s1181_s28, %s913_s18 }
  0x1f   : > { %p909_p11 = scmp.ne.s32.totalorder %s1181_s28, %s908_s17  ;;  %p916_p1 = scmp.lt.s32.totalorder %s914_s22, %s908_s17 }
  0x21   : > { %p910_p12 = pnand %p909_p11, %p1066_p5  ;;  %p917_p2 = por %p916_p1, %p915_p0 }
  0x22   : > { %435 = vperm.xlu1 %901, %v414_v10   ;;  %430 = vperm.xlu0 %900, %v413_v11  }
  0x23   : > { %p911_p13 = pneg %p910_p12 }
  0x25   : > { %p918_p3 = pnand %p917_p2, %p911_p13 }
  0x26   : > { %445 = vperm.xlu1 %901, %v416_v12   ;;  %440 = vperm.xlu0 %900, %v415_v13  }
  0x2a   : > { %592 = vperm.xlu1 %901, %v587_v14   ;;  %450 = vperm.xlu0 %900, %v417_v15  }
  0x2e   : > { %602 = vperm.xlu1 %901, %v589_v16   ;;  %597 = vperm.xlu0 %900, %v588_v17  }
  0x32   : > { %694 = vperm.xlu1 %901, %v685_v18   ;;  %689 = vperm.xlu0 %900, %v684_v19  }
  0x36   : > { %730 = vperm.xlu1 %901, %v727_v20   ;;  %699 = vperm.xlu0 %900, %v686_v21  }
  0x91   : > { %v376_v29 = vpop.permute.xlu1 %375  ;;  %v341_v30 = vpop.permute.xlu0 %340 }
  0x92   : > { %v364_v31 = vmul.f32 %v357_v27, %v341_v30  ;;  %v365_v32 = vmul.f32 %v361_v28, %v341_v30 }
  0x94   : > { %v388_v33 = vadd.f32 %v376_v29, %v364_v31  ;;  %v389_v36 = vadd.f32 %v376_v29, %v365_v32 }
  0x95   : > { %v381_v34 = vpop.permute.xlu1 %380  ;;  %v346_v35 = vpop.permute.xlu0 %345 }
  0x96   : > { %v366_v37 = vmul.f32 %v357_v27, %v346_v35  ;;  %v367_v38 = vmul.f32 %v361_v28, %v346_v35  ;;  %v395_v42 = vmax.f32 %v389_v36, 0.0  ;;  %v394_v43 = vmax.f32 %v388_v33, 0.0 }
  0x98   : > { %v390_v39 = vadd.f32 %v381_v34, %v366_v37  ;;  %v391_v40 = vadd.f32 %v381_v34, %v367_v38 }
  0x99   : > { %v351_v41 = vpop.permute.xlu0 %350  ;;  %v386_v48 = vpop.permute.xlu1 %385 }
  0x9a   : > { %v368_v44 = vmul.f32 %v357_v27, %v351_v41  ;;  %v369_v45 = vmul.f32 %v361_v28, %v351_v41  ;;  %v397_v46 = vmax.f32 %v391_v40, 0.0  ;;  %v396_v47 = vmax.f32 %v390_v39, 0.0 }
  0x9c   : > { %v392_v49 = vadd.f32 %v386_v48, %v368_v44  ;;  %v393_v50 = vadd.f32 %v386_v48, %v369_v45  ;;  %v408_v51 = vpack.c.bf16 %v397_v46, %v395_v42  ;;  %v407_v52 = vpack.c.bf16 %v396_v47, %v394_v43 }
  0x9d   : > { %v421_v62 = vpop.permute.xlu0 %420  ;;  %v426_v2 = vpop.permute.xlu1 %425 }
  0x9e   : > { %v399_v53 = vmax.f32 %v393_v50, 0.0  ;;  %491 = vmatprep.subr.bf16.mxu0 %v408_v51  ;;  %v398_v54 = vmax.f32 %v392_v49, 0.0 }
  0x9f   : > { %492 = vmatpush1.bf16.msra.mxu0 %v407_v52 }
  0xa0   : > { %v410_v55 = vpack.c.bf16 %v399_v53, %v399_v53  ;;  %v409_v56 = vpack.c.bf16 %v398_v54, %v398_v54 }
  0xa1   : > { %v431_v14 = vpop.permute.xlu0 %430  ;;  %v436_v19 = vpop.permute.xlu1 %435 }
  0xa2   : > { %843 = vmatprep.subr.msk.bf16.mxu0 %vm484_vm0, %v410_v55  ;;  %v486_v57 = vsel %vm484_vm0, %v409_v56, 0 }
  0xa3   : > { %494 = vmatpush1.bf16.msra.mxu0 %v486_v57 }
  0xa5   : > { %v441_v33 = vpop.permute.xlu0 %440  ;;  %v446_v38 = vpop.permute.xlu1 %445 }
  0xa6   : > { %844 = vmatmul.mubr.msk.bf16.vlgmr.msra.gmra.mrb[0].mxu0 %vm471_vm1, %v902_v58 }
  0xa7   : > { %533 = vmatprep.mubr.bf16.mxu0 %v972_v3 }
  0xa9   : > { %v451_v49 = vpop.permute.xlu0 %450 }
  0xae   : > { %845 = vmatmul.mubr.msk.bf16.gmra.mrb[4].mxu0 %vm471_vm1, %v903_v59 }
  0xaf   : > { %543 = vmatprep.mubr.bf16.mxu0 %v972_v3 }
  0xb6   : > { %846 = vmatmul.mubr.msk.bf16.gmra.mrb[8].mxu0 %vm471_vm1, %v904_v60 }
  0xb7   : > { %553 = vmatprep.mubr.bf16.mxu0 %v972_v3 }
  0xbe   : > { %847 = vmatmul.mubr.msk.bf16.gmra.mrb[12].mxu0 %vm471_vm1, %v905_v61 }
 0x179   : > { %v525_v63 = vpop.f32.mrb[0].mxu0 }
 0x17a   : > { %v526_v0 = vadd.f32 %v525_v63, %v421_v62  ;;  %v527_v1 = vpop.f32.mrb[1].mxu0  ;;  %v907_v63 = vld [vmem:[%s1226_s5 + $0x8] ss:$0 sps:$4 sm:$0x33]  }
 0x17b   : > { %v528_v4 = vadd.f32 %v527_v1, %v421_v62  ;;  %v529_v5 = vpop.f32.mrb[2].mxu0  ;;  %v906_v62 = vld [vmem:[%s1226_s5] sm:$0xff]  }
 0x17c   : > { %v530_v6 = vadd.f32 %v529_v5, %v426_v2  ;;  %v531_v7 = vpop.f32.mrb[3].mxu0  ;;  %v562_v9 = vmax.f32 %v526_v0, 0.0  ;;  %v593_v0 = vpop.permute.xlu1 %592 }
 0x17d   : > { %v532_v8 = vadd.f32 %v531_v7, %v426_v2  ;;  %v563_v11 = vmax.f32 %v528_v4, 0.0  ;;  %v598_v2 = vpop.permute.xlu0 %597 }
 0x17e   : > { %v564_v10 = vmax.f32 %v530_v6, 0.0 }
 0x17f   : > { %v565_v12 = vmax.f32 %v532_v8, 0.0 }
 0x180   : > { %v579_v13 = vpack.c.bf16 %v564_v10, %v562_v9  ;;  %v603_v1 = vpop.permute.xlu1 %602 }
 0x181   : > { %v535_v15 = vpop.f32.mrb[4].mxu0  ;;  %v580_v16 = vpack.c.bf16 %v565_v12, %v563_v11 }
 0x182   : > { %v536_v17 = vadd.f32 %v535_v15, %v431_v14  ;;  %v537_v18 = vpop.f32.mrb[5].mxu0  ;;  %v690_v15 = vpop.permute.xlu0 %689 }
 0x183   : > { %v538_v20 = vadd.f32 %v537_v18, %v431_v14  ;;  %v539_v21 = vpop.f32.mrb[6].mxu0  ;;  %627 = vmatprep.subr.bf16.mxu1 %v580_v16 }
 0x184   : > { %v540_v25 = vadd.f32 %v539_v21, %v436_v19  ;;  %v541_v26 = vpop.f32.mrb[7].mxu0  ;;  %628 = vmatpush1.bf16.msra.mxu1 %v579_v13  ;;  %v566_v28 = vmax.f32 %v536_v17, 0.0 }
 0x185   : > { %v542_v27 = vadd.f32 %v541_v26, %v436_v19  ;;  %v567_v30 = vmax.f32 %v538_v20, 0.0 }
 0x186   : > { %v568_v29 = vmax.f32 %v540_v25, 0.0 }
 0x187   : > { %v569_v31 = vmax.f32 %v542_v27, 0.0 }
 0x188   : > { %v581_v32 = vpack.c.bf16 %v568_v29, %v566_v28 }
 0x189   : > { %v582_v34 = vpack.c.bf16 %v569_v31, %v567_v30  ;;  %v545_v35 = vpop.f32.mrb[8].mxu0 }
 0x18a   : > { %v546_v36 = vadd.f32 %v545_v35, %v441_v33  ;;  %v547_v37 = vpop.f32.mrb[9].mxu0 }
 0x18b   : > { %v548_v39 = vadd.f32 %v547_v37, %v441_v33  ;;  %v549_v40 = vpop.f32.mrb[10].mxu0  ;;  %629 = vmatprep.subr.bf16.mxu1 %v582_v34  ;;  %v700_v33 = vpop.permute.xlu0 %699 }
 0x18c   : > { %v550_v41 = vadd.f32 %v549_v40, %v446_v38  ;;  %v551_v42 = vpop.f32.mrb[11].mxu0  ;;  %630 = vmatpush1.bf16.msra.mxu1 %v581_v32  ;;  %v570_v44 = vmax.f32 %v546_v36, 0.0 }
 0x18d   : > { %v552_v43 = vadd.f32 %v551_v42, %v446_v38  ;;  %v571_v46 = vmax.f32 %v548_v39, 0.0 }
 0x18e   : > { %v572_v45 = vmax.f32 %v550_v41, 0.0 }
 0x18f   : > { %v573_v47 = vmax.f32 %v552_v43, 0.0 }
 0x190   : > { %v583_v48 = vpack.c.bf16 %v572_v45, %v570_v44 }
 0x191   : > { %v584_v50 = vpack.c.bf16 %v573_v47, %v571_v46  ;;  %v555_v51 = vpop.f32.mrb[12].mxu0  ;;  %v973_v47 = vmov 1966171168  }
 0x192   : > { %v556_v52 = vadd.f32 %v555_v51, %v451_v49  ;;  %v557_v53 = vpop.f32.mrb[13].mxu0 }
 0x193   : > { %v558_v54 = vadd.f32 %v557_v53, %v451_v49  ;;  %v559_v55 = vpop.f32.mrb[14].mxu0  ;;  %631 = vmatprep.subr.bf16.mxu1 %v584_v50 }
 0x194   : > { %v574_v56 = vmax.f32 %v556_v52, 0.0  ;;  %v560_v57 = vpop.f32.mrb[15].mxu0  ;;  %632 = vmatpush1.bf16.msra.mxu1 %v583_v48  ;;  %v743_v48 = vunpack.c.l.s4 %v973_v47 }
 0x195   : > { %v575_v58 = vmax.f32 %v558_v54, 0.0 }
 0x196   : > { %v585_v59 = vpack.c.bf16 %v574_v56, %v574_v56  ;;  %v744_v54 = vunpack.c.0.s8 %v743_v48 }
 0x197   : > { %v586_v60 = vpack.c.bf16 %v575_v58, %v575_v58 }
 0x198   : > { %v622_v61 = vsel %vm620_vm2, %v585_v59, 0 }
 0x199   : > { %850 = vmatprep.subr.msk.bf16.mxu1 %vm620_vm2, %v586_v60  ;;  %v747_v60 = vsub.s32 %v744_v54, %v1139_v23 }
 0x19a   : > { %634 = vmatpush1.bf16.msra.mxu1 %v622_v61 }
 0x19d   : > { %851 = vmatmul.mubr.msk.bf16.vlgmr.msra.gmra.mrb[0].mxu1 %vm613_vm3, %v906_v62 }
 0x19e   : > { %669 = vmatprep.mubr.bf16.mxu1 %v972_v3  ;;  %v695_v3 = vpop.permute.xlu1 %694 }
 0x1a2   : > { %v731_v50 = vpop.permute.xlu1 %730 }
 0x1a3   : > { %v736_v55 = vrot.slane %v731_v50, %v356_v24 }
 0x1a5   : > { %852 = vmatmul.mubr.msk.bf16.gmra.mrb[4].mxu1 %vm613_vm3, %v907_v63 }
 0x270   : > { %v661_v4 = vpop.f32.mrb[0].mxu1 }
 0x271   : > { %v662_v5 = vadd.f32 %v661_v4, %v593_v0  ;;  %v663_v6 = vpop.f32.mrb[1].mxu1 }
 0x272   : > { %v664_v7 = vadd.f32 %v663_v6, %v593_v0  ;;  %v665_v8 = vpop.f32.mrb[2].mxu1 }
 0x273   : > { %v678_v9 = vmax.f32 %v662_v5, 0.0  ;;  %v666_v10 = vadd.f32 %v665_v8, %v598_v2  ;;  %v667_v11 = vpop.f32.mrb[3].mxu1 }
 0x274   : > { %v679_v12 = vmax.f32 %v664_v7, 0.0  ;;  %v668_v13 = vadd.f32 %v667_v11, %v598_v2 }
 0x275   : > { %v680_v14 = vmax.f32 %v666_v10, 0.0  ;;  %v702_v17 = vmul.f32 %v690_v15, %v678_v9 }
 0x276   : > { %v681_v16 = vmax.f32 %v668_v13, 0.0  ;;  %v703_v19 = vmul.f32 %v690_v15, %v679_v12 }
 0x277   : > { %v704_v18 = vmul.f32 %v695_v3, %v680_v14 }
 0x278   : > { %v705_v20 = vmul.f32 %v695_v3, %v681_v16  ;;  %v671_v21 = vpop.f32.mrb[4].mxu1 }
 0x279   : > { %v708_v25 = vadd.f32 %v704_v18, %v702_v17  ;;  %v672_v26 = vadd.f32 %v671_v21, %v603_v1  ;;  %v673_v27 = vpop.f32.mrb[5].mxu1 }
 0x27a   : > { %v718_v28 = vadd.f32 %v705_v20, %v703_v19  ;;  %v674_v29 = vadd.f32 %v673_v27, %v603_v1  ;;  %v675_v30 = vpop.f32.mrb[6].mxu1 }
 0x27b   : > { %v682_v31 = vmax.f32 %v672_v26, 0.0  ;;  %v676_v32 = vpop.f32.mrb[7].mxu1 }
 0x27c   : > { %v683_v34 = vmax.f32 %v674_v29, 0.0 }
 0x27d   : > { %v706_v35 = vmul.f32 %v700_v33, %v682_v31 }
 0x27e   : > { %v707_v36 = vmul.f32 %v700_v33, %v683_v34 }
 0x27f   : > { %v710_v37 = vsel %vm709_vm4, %v706_v35, 0.0 }
 0x280   : > { %v711_v38 = vadd.f32 %v710_v37, %v708_v25  ;;  %v719_v39 = vsel %vm709_vm4, %v707_v36, 0.0 }
 0x281   : > { %v720_v40 = vadd.f32 %v719_v39, %v718_v28 }
 0x282   : > { %v712_v41 = vrot.slane %v711_v38, 4 }
 0x283   : > { %v721_v42 = vrot.slane %v720_v40, 4 }
 0x284   : > { %v713_v43 = vadd.f32 %v712_v41, %v711_v38 }
 0x285   : > { %v722_v44 = vadd.f32 %v721_v42, %v720_v40 }
 0x286   : > { %v714_v45 = vrot.slane %v713_v43, 2 }
 0x287   : > { %v723_v46 = vrot.slane %v722_v44, 2 }
 0x288   : > { %v715_v49 = vadd.f32 %v714_v45, %v713_v43 }
 0x289   : > { %v724_v51 = vadd.f32 %v723_v46, %v722_v44 }
 0x28a   : > { %v716_v52 = vrot.slane %v715_v49, 1 }
 0x28b   : > { %v725_v53 = vrot.slane %v724_v51, 1 }
 0x28c   : > { %v717_v56 = vadd.f32 %v716_v52, %v715_v49 }
 0x28d   : > { %v726_v57 = vadd.f32 %v725_v53, %v724_v51 }
 0x28e   : > { %v737_v58 = vadd.f32 %v736_v55, %v717_v56 }
 0x28f   : > { %v738_v59 = vadd.f32 %v736_v55, %v726_v57 }
 0x291   : > { %v741_v61 = vcombine.low %v737_v58, %v738_v59 }
 0x293   : > { %v748_v62 = vrot.slane %v741_v61, %v747_v60 }
 0x295   : > { %v755_v63 = vrot.slane %v748_v62, %v747_v60 }
 0x297   : > { %761 = vst.msk [vmem:[%s326_s27] sm:$0x3] %vm759_vm5, %v755_v63 }
 0x298   : > { %921 = shalt.err (!%p918_p3)
}
 0x299   : > { %s922_s23 = scalar_lea.hbm %s1179_s10, 32  ;;  %s926_s26 = scalar_lea.hbm %s1230_s9, 128 }
 0x29a   : > { %p923_p4 = scmp.ne.s32.totalorder %s1179_s10, %s922_s23  ;;  %p927_p9 = scmp.lt.u32.totalorder %s1179_s10, %s1230_s9 }
 0x29b   : > { %p928_p10 = scmp.lt.u32.totalorder %s926_s26, %s922_s23  ;;  %p930_p12 = scmp.lt.u32.totalorder %s922_s23, %s1179_s10 }
 0x29c   : > { %p924_p7 = pnand %p923_p4, %p1066_p5 }
 0x29d   : > { %p929_p11 = por %p928_p10, %p927_p9 }
 0x29e   : > { %p925_p8 = pneg %p924_p7 }
 0x29f   : > { %p931_p13 = por %p930_p12, %p929_p11 }
 0x2a1   : > { %p932_p0 = pnand %p931_p13, %p925_p8 }
 0x2a3   : > { %935 = shalt.err (!%p932_p0)
}
 0x2a4   : > { %859 = dma.vmem_to_hbm [thread:$0]  (%p1066_p5), %s1181_s28, 32, %s1179_s10, %s763_s15  }
 0x2a5 PF: > { %p865_p1 = scmp.ge.s32.totalorder %s970_s14, 2  ;;  %s789_s30 = sand.u32 1, %s958_s11  }
 0x2a6   : > { %s790_s17 = scalar_lea.sflag [#allocation4], %s789_s30 }
 0x2a7   : > { %p862_p2 = pnand %p865_p1, %p1070_p6 }
 0x2a9   : > { %953 = dma.done.wait (!%p862_p2), %s790_s17, 32  }
 0x2aa   : > { %955 = vsyncadd (!%p862_p2), %s790_s17, 4294967264  ;;  %p21_p3 = scmp.ge.s32.totalorder %s1053_s16, 6   ;;  %s1233_s11 = smov %s962_s12 }
 0x2ab   : > { %s1234_s12 = smov %s966_s13  ;;  %s1235_s13 = smov %s1064_s19 }
 0x2ac   : > { %s1236_s14 = smov %s1053_s16  ;;  %23 = sbr.rel (!%p21_p3) target bundleno = 6 (0x6), region = 91 }
 0x2b3   :  { %795 = vsyncpa [#allocation4], 1 }
 0x2b4   :  { %797 = vsyncpa [#allocation4 + $0x1], 1 }

</bundles_post_ra>
